<compile_context>
chip_gen: v7x
topology: tpu7x:2x2x1
jax: 0.10.0
libtpu: 0.0.40
codegen_flags: <defaults>
</compile_context>

<pallas_src>
import functools

import jax
import jax.numpy as jnp
from jax.experimental import pallas as pl
from jax.experimental.pallas import tpu as pltpu

NUM_KERNELS = 5
LAYERS = (8, 64, 32, 16, 2)  # input_size=8, output_size=2


def _round_up(n, m):
    return ((n + m - 1) // m) * m


def _choose_tiling(B, b_tile):
    """Pick (tile, n_tiles, padded_B) for the 1-D batch grid.

    - Pad the batch to a multiple of 128 (lane granularity) only.
    - Ensure >=2 tiles (preferably an even count) when the batch allows it,
      so v7x's two TensorCores both get work via dimension_semantics.
    - Never emit tiles that would be 100% padding.
    """
    B128 = _round_up(max(B, 1), 128)
    n = pl.cdiv(B128, b_tile)
    if B128 >= 256:
        n = max(n, 2)               # at least 2 tiles for the v7x 2-TC split
    if n > 1 and n % 2:
        n += 1                      # prefer an even tile count
    bt = _round_up(pl.cdiv(B128, n), 128)
    n = pl.cdiv(B128, bt)           # drop tiles that would be pure padding
    return bt, n, n * bt


def pkan_kernel(centers_ref, ninv_ref, wsum_ref,              # SMEM (5,) each
                x_ref,                                         # (8, Bt) VMEM
                w1_ref, b1_ref, w2_ref, b2_ref,                # resident weights
                w3_ref, b3_ref, w4_ref, b4_ref,                # resident weights
                o_ref,                                         # (2, Bt) VMEM out
                *, compute_dtype):
    cd = compute_dtype
    x = x_ref[...]                                             # (8, Bt), dtype=cd

    # Linear(8,64) + ReLU   (Dropout -> identity in eval)
    h1 = jnp.dot(w1_ref[...], x, preferred_element_type=jnp.float32) + b1_ref[...]
    h1 = jnp.maximum(h1, 0.0).astype(cd)                       # (64, Bt)

    # Linear(64,32) + ReLU
    h2 = jnp.dot(w2_ref[...], h1, preferred_element_type=jnp.float32) + b2_ref[...]
    h2 = jnp.maximum(h2, 0.0).astype(cd)                       # (32, Bt)

    # KANLayer(32,32) with the bias folded into the next Linear's bias:
    #   acc = sum_k colsum(W_kan)[k] * exp(-(h2 - c_k)^2 / (2*w_k^2))
    acc = None
    for k in range(NUM_KERNELS):                               # static unroll, 5 iters
        c = centers_ref[k].astype(cd)
        a = ninv_ref[k].astype(cd)                             # -1 / (2*w_k^2)
        w = wsum_ref[k].astype(cd)                             # colsum(W_kan)[k]
        d = h2 - c
        g = jnp.exp(d * d * a) * w
        acc = g if acc is None else acc + g                    # (32, Bt)

    # Linear(32,16) + ReLU   (b3 already contains W3 @ kan_bias)
    h3 = jnp.dot(w3_ref[...], acc, preferred_element_type=jnp.float32) + b3_ref[...]
    h3 = jnp.maximum(h3, 0.0).astype(cd)                       # (16, Bt)

    # Linear(16,2)
    o_ref[...] = (jnp.dot(w4_ref[...], h3, preferred_element_type=jnp.float32)
                  + b4_ref[...]).astype(o_ref.dtype)


def make_params(key):
    ks = jax.random.split(key, 10)
    p = {}
    # Linear layers stored feature-major (out_dim, in_dim), matching PyTorch.
    p["w1"] = 0.1 * jax.random.normal(ks[0], (LAYERS[1], LAYERS[0]), jnp.float32)
    p["b1"] = 0.1 * jax.random.normal(ks[1], (LAYERS[1],), jnp.float32)
    p["w2"] = 0.1 * jax.random.normal(ks[2], (LAYERS[2], LAYERS[1]), jnp.float32)
    p["b2"] = 0.1 * jax.random.normal(ks[3], (LAYERS[2],), jnp.float32)
    p["w3"] = 0.1 * jax.random.normal(ks[4], (LAYERS[3], LAYERS[2]), jnp.float32)
    p["b3"] = 0.1 * jax.random.normal(ks[5], (LAYERS[3],), jnp.float32)
    p["w4"] = 0.1 * jax.random.normal(ks[6], (LAYERS[4], LAYERS[3]), jnp.float32)
    p["b4"] = 0.1 * jax.random.normal(ks[7], (LAYERS[4],), jnp.float32)
    # KANLayer params (shapes match nn.Parameter in __init__).  kan_bias is
    # made non-zero here (PyTorch inits it to zeros) so the host-side bias
    # fold is actually exercised by the test.
    p["kan_w"] = jax.random.normal(ks[8], (LAYERS[2], NUM_KERNELS), jnp.float32)
    p["kan_bias"] = 0.1 * jax.random.normal(ks[9], (LAYERS[2],), jnp.float32)
    p["centers"] = jnp.linspace(-1.0, 1.0, NUM_KERNELS).astype(jnp.float32)
    p["kan_widths"] = jnp.ones((NUM_KERNELS,), jnp.float32) * 0.1
    return p


def pkan_forward_fm(xt, params, *, b_tile=8192, use_bf16=False):
    """Feature-major entry point: xt has shape (8, B) -> returns (2, B).

    Callers that can produce x feature-major (e.g. on v5e, where the extra
    transpose pass costs real HBM bandwidth) should call this directly.
    """
    F_in, B = xt.shape
    assert F_in == LAYERS[0]
    cd = jnp.bfloat16 if use_bf16 else jnp.float32

    bt, n_tiles, B_pad = _choose_tiling(B, b_tile)

    xt = xt.astype(cd)
    if B_pad != B:
        xt = jnp.pad(xt, ((0, 0), (0, B_pad - B)))

    # Derived KAN scalars (tiny host-side/XLA prep).
    wsum = jnp.sum(params["kan_w"], axis=0).astype(jnp.float32)            # (5,)
    ninv = (-1.0 / (2.0 * params["kan_widths"] ** 2)).astype(jnp.float32)  # (5,)
    centers = params["centers"].astype(jnp.float32)                        # (5,)

    col = lambda b: b.reshape(-1, 1).astype(jnp.float32)
    wcast = lambda w: w.astype(cd)
    w1, b1 = wcast(params["w1"]), col(params["b1"])
    w2, b2 = wcast(params["w2"]), col(params["b2"])
    # Fold the KAN bias into b3: relu(W3 @ (acc + kb) + b3) == relu(W3 @ acc + (b3 + W3 @ kb))
    b3_eff = params["b3"] + params["w3"] @ params["kan_bias"]
    w3, b3 = wcast(params["w3"]), col(b3_eff)
    w4, b4 = wcast(params["w4"]), col(params["b4"])

    smem_spec = pl.BlockSpec(memory_space=pltpu.MemorySpace.SMEM)

    def resident(arr):
        # Full-array block, constant index -> fetched once, stays in VMEM.
        return pl.BlockSpec(arr.shape, lambda i: (0,) * arr.ndim)

    # Per-tile VMEM footprint estimate (f32-equivalent intermediates + I/O
    # double-buffers + headroom).  Set explicitly so big tiles compile under
    # v5e's 16 MiB scoped default and stay below v7x's 64 MiB physical VMEM.
    vmem_limit = int(min(max(16 << 20, (8 << 20) + 1000 * bt), 48 << 20))

    kernel = functools.partial(pkan_kernel, compute_dtype=cd)

    out_pad = pl.pallas_call(
        kernel,
        out_shape=jax.ShapeDtypeStruct((LAYERS[4], B_pad), jnp.float32),
        grid=(n_tiles,),
        in_specs=[
            smem_spec, smem_spec, smem_spec,                       # KAN scalars
            pl.BlockSpec((LAYERS[0], bt), lambda i: (0, i)),       # x tile
            resident(w1), resident(b1),
            resident(w2), resident(b2),
            resident(w3), resident(b3),
            resident(w4), resident(b4),
        ],
        out_specs=pl.BlockSpec((LAYERS[4], bt), lambda i: (0, i)),
        compiler_params=pltpu.CompilerParams(
            dimension_semantics=("parallel",),                     # megacore on v7x
            vmem_limit_bytes=vmem_limit,
        ),
    )(centers, ninv, wsum, xt, w1, b1, w2, b2, w3, b3, w4, b4)

    return out_pad[:, :B]                                          # (2, B)


def pkan_forward(x, params, *, b_tile=8192, use_bf16=False):
    """x: (B, 8) float32 -> (B, 2) float32.

    TODO(synk): on v5e, prefer pkan_forward_fm with a feature-major producer
    to avoid the standalone transpose pass over x.
    """
    xt = jnp.asarray(x, jnp.float32).T                             # (8, B)
    return pkan_forward_fm(xt, params, b_tile=b_tile, use_bf16=use_bf16).T


def pkan_reference(x, p):
    """Pure-JAX reference mirroring the PyTorch forward literally (eval mode)."""
    h1 = jnp.maximum(x @ p["w1"].T + p["b1"], 0.0)
    h2 = jnp.maximum(h1 @ p["w2"].T + p["b2"], 0.0)
    # Literal KANLayer formula (3-D kernels tensor, matmul with W^T, sum).
    kern = jnp.exp(-((h2[..., None] - p["centers"]) ** 2)
                   / (2.0 * p["kan_widths"] ** 2))                 # (B, 32, 5)
    act = jnp.sum(jnp.matmul(kern, p["kan_w"].T), axis=-1) + p["kan_bias"]
    h3 = jnp.maximum(act @ p["w3"].T + p["b3"], 0.0)
    return h3 @ p["w4"].T + p["b4"]


if __name__ == "__main__":
    key = jax.random.PRNGKey(0)
    k_x, k_p = jax.random.split(key)
    params = make_params(k_p)

    # B=4: tiny sanity shape.  B=300: exercises 128-granular padding and a
    # multi-tile (2-tile) grid without large compute.
    for B in (4, 300):
        x = jax.random.normal(jax.random.fold_in(k_x, B), (B, LAYERS[0]), jnp.float32)
        ref = pkan_reference(x, params)

        out = jax.block_until_ready(pkan_forward(x, params))
        assert out.shape == (B, LAYERS[4])
        assert jnp.allclose(out, ref, atol=1e-4, rtol=1e-4), "f32 mismatch vs reference"

        # Optional bf16 fast path (recommended for v6e/v7x); looser tolerance.
        out_bf16 = jax.block_until_ready(pkan_forward(x, params, use_bf16=True))
        assert out_bf16.shape == (B, LAYERS[4])
        assert bool(jnp.all(jnp.isfinite(out_bf16))), "bf16 produced non-finite values"
        assert jnp.allclose(out_bf16, ref, atol=2e-1, rtol=2e-1), "bf16 mismatch vs reference"

    print("KERNEL_OK")
</pallas_src>

<mosaic_0001>
module attributes {stable_mosaic.version = 11 : i64} {
  func.func @pkan_kernel(%arg0: i32, %arg1: memref<5xf32, #tpu.memory_space<smem>>, %arg2: memref<5xf32, #tpu.memory_space<smem>>, %arg3: memref<5xf32, #tpu.memory_space<smem>>, %arg4: memref<8x128xf32, #tpu.memory_space<vmem>>, %arg5: memref<64x8xf32, #tpu.memory_space<vmem>>, %arg6: memref<64x1xf32, #tpu.memory_space<vmem>>, %arg7: memref<32x64xf32, #tpu.memory_space<vmem>>, %arg8: memref<32x1xf32, #tpu.memory_space<vmem>>, %arg9: memref<16x32xf32, #tpu.memory_space<vmem>>, %arg10: memref<16x1xf32, #tpu.memory_space<vmem>>, %arg11: memref<2x16xf32, #tpu.memory_space<vmem>>, %arg12: memref<2x1xf32, #tpu.memory_space<vmem>>, %arg13: memref<2x128xf32, #tpu.memory_space<vmem>>) attributes {dimension_semantics = [#tpu.dimension_semantics<parallel>], iteration_bounds = array<i64: 1>, scalar_prefetch = 0 : i64, scratch_operands = 0 : i64, tpu.core_type = #tpu.core_type<tc>, window_params = [{transform_indices = @transform_0, window_bounds = array<i64: 5>}, {transform_indices = @transform_1, window_bounds = array<i64: 5>}, {transform_indices = @transform_2, window_bounds = array<i64: 5>}, {transform_indices = @transform_3, window_bounds = array<i64: 8, 128>}, {pipeline_mode = #tpu.pipeline_mode<synchronous>, transform_indices = @transform_4, window_bounds = array<i64: 64, 8>}, {pipeline_mode = #tpu.pipeline_mode<synchronous>, transform_indices = @transform_5, window_bounds = array<i64: 64, 1>}, {pipeline_mode = #tpu.pipeline_mode<synchronous>, transform_indices = @transform_6, window_bounds = array<i64: 32, 64>}, {pipeline_mode = #tpu.pipeline_mode<synchronous>, transform_indices = @transform_7, window_bounds = array<i64: 32, 1>}, {pipeline_mode = #tpu.pipeline_mode<synchronous>, transform_indices = @transform_8, window_bounds = array<i64: 16, 32>}, {pipeline_mode = #tpu.pipeline_mode<synchronous>, transform_indices = @transform_9, window_bounds = array<i64: 16, 1>}, {pipeline_mode = #tpu.pipeline_mode<synchronous>, transform_indices = @transform_10, window_bounds = array<i64: 2, 16>}, {pipeline_mode = #tpu.pipeline_mode<synchronous>, transform_indices = @transform_11, window_bounds = array<i64: 2, 1>}, {transform_indices = @transform_12, window_bounds = array<i64: 2, 128>}]} {
    %c0 = arith.constant 0 : index
    %c0_0 = arith.constant 0 : index
    %0 = vector.load %arg4[%c0, %c0_0] : memref<8x128xf32, #tpu.memory_space<vmem>>, vector<8x128xf32>
    %c0_1 = arith.constant 0 : index
    %c0_2 = arith.constant 0 : index
    %1 = vector.load %arg5[%c0_1, %c0_2] : memref<64x8xf32, #tpu.memory_space<vmem>>, vector<64x8xf32>
    %cst = arith.constant dense<0.000000e+00> : vector<64x128xf32>
    %2 = tpu.matmul %1, %0, %cst {dimension_numbers = #tpu.dot_dimension_numbers<[1], [0], [0], [1], [0, 0, 1, 1], [], []>} : vector<64x8xf32>, vector<8x128xf32>, vector<64x128xf32> -> vector<64x128xf32>
    %c0_3 = arith.constant 0 : index
    %c0_4 = arith.constant 0 : index
    %3 = vector.load %arg6[%c0_3, %c0_4] : memref<64x1xf32, #tpu.memory_space<vmem>>, vector<64x1xf32>
    %4 = vector.broadcast %3 : vector<64x1xf32> to vector<64x128xf32>
    %5 = arith.addf %2, %4 : vector<64x128xf32>
    %cst_5 = arith.constant 0.000000e+00 : f32
    %6 = vector.broadcast %cst_5 : f32 to vector<64x128xf32>
    %7 = arith.maximumf %5, %6 : vector<64x128xf32>
    %c0_6 = arith.constant 0 : index
    %c0_7 = arith.constant 0 : index
    %8 = vector.load %arg7[%c0_6, %c0_7] : memref<32x64xf32, #tpu.memory_space<vmem>>, vector<32x64xf32>
    %cst_8 = arith.constant dense<0.000000e+00> : vector<32x128xf32>
    %9 = tpu.matmul %8, %7, %cst_8 {dimension_numbers = #tpu.dot_dimension_numbers<[1], [0], [0], [1], [0, 0, 1, 1], [], []>} : vector<32x64xf32>, vector<64x128xf32>, vector<32x128xf32> -> vector<32x128xf32>
    %c0_9 = arith.constant 0 : index
    %c0_10 = arith.constant 0 : index
    %10 = vector.load %arg8[%c0_9, %c0_10] : memref<32x1xf32, #tpu.memory_space<vmem>>, vector<32x1xf32>
    %11 = vector.broadcast %10 : vector<32x1xf32> to vector<32x128xf32>
    %12 = arith.addf %9, %11 : vector<32x128xf32>
    %cst_11 = arith.constant 0.000000e+00 : f32
    %13 = vector.broadcast %cst_11 : f32 to vector<32x128xf32>
    %14 = arith.maximumf %12, %13 : vector<32x128xf32>
    %c0_12 = arith.constant 0 : index
    %15 = memref.load %arg1[%c0_12] : memref<5xf32, #tpu.memory_space<smem>>
    %c0_13 = arith.constant 0 : index
    %16 = memref.load %arg2[%c0_13] : memref<5xf32, #tpu.memory_space<smem>>
    %c0_14 = arith.constant 0 : index
    %17 = memref.load %arg3[%c0_14] : memref<5xf32, #tpu.memory_space<smem>>
    %18 = vector.broadcast %15 : f32 to vector<32x128xf32>
    %19 = arith.subf %14, %18 : vector<32x128xf32>
    %20 = arith.mulf %19, %19 : vector<32x128xf32>
    %21 = vector.broadcast %16 : f32 to vector<32x128xf32>
    %22 = arith.mulf %20, %21 : vector<32x128xf32>
    %23 = math.exp %22 : vector<32x128xf32>
    %24 = vector.broadcast %17 : f32 to vector<32x128xf32>
    %25 = arith.mulf %23, %24 : vector<32x128xf32>
    %c1 = arith.constant 1 : index
    %26 = memref.load %arg1[%c1] : memref<5xf32, #tpu.memory_space<smem>>
    %c1_15 = arith.constant 1 : index
    %27 = memref.load %arg2[%c1_15] : memref<5xf32, #tpu.memory_space<smem>>
    %c1_16 = arith.constant 1 : index
    %28 = memref.load %arg3[%c1_16] : memref<5xf32, #tpu.memory_space<smem>>
    %29 = vector.broadcast %26 : f32 to vector<32x128xf32>
    %30 = arith.subf %14, %29 : vector<32x128xf32>
    %31 = arith.mulf %30, %30 : vector<32x128xf32>
    %32 = vector.broadcast %27 : f32 to vector<32x128xf32>
    %33 = arith.mulf %31, %32 : vector<32x128xf32>
    %34 = math.exp %33 : vector<32x128xf32>
    %35 = vector.broadcast %28 : f32 to vector<32x128xf32>
    %36 = arith.mulf %34, %35 : vector<32x128xf32>
    %37 = arith.addf %25, %36 : vector<32x128xf32>
    %c2 = arith.constant 2 : index
    %38 = memref.load %arg1[%c2] : memref<5xf32, #tpu.memory_space<smem>>
    %c2_17 = arith.constant 2 : index
    %39 = memref.load %arg2[%c2_17] : memref<5xf32, #tpu.memory_space<smem>>
    %c2_18 = arith.constant 2 : index
    %40 = memref.load %arg3[%c2_18] : memref<5xf32, #tpu.memory_space<smem>>
    %41 = vector.broadcast %38 : f32 to vector<32x128xf32>
    %42 = arith.subf %14, %41 : vector<32x128xf32>
    %43 = arith.mulf %42, %42 : vector<32x128xf32>
    %44 = vector.broadcast %39 : f32 to vector<32x128xf32>
    %45 = arith.mulf %43, %44 : vector<32x128xf32>
    %46 = math.exp %45 : vector<32x128xf32>
    %47 = vector.broadcast %40 : f32 to vector<32x128xf32>
    %48 = arith.mulf %46, %47 : vector<32x128xf32>
    %49 = arith.addf %37, %48 : vector<32x128xf32>
    %c3 = arith.constant 3 : index
    %50 = memref.load %arg1[%c3] : memref<5xf32, #tpu.memory_space<smem>>
    %c3_19 = arith.constant 3 : index
    %51 = memref.load %arg2[%c3_19] : memref<5xf32, #tpu.memory_space<smem>>
    %c3_20 = arith.constant 3 : index
    %52 = memref.load %arg3[%c3_20] : memref<5xf32, #tpu.memory_space<smem>>
    %53 = vector.broadcast %50 : f32 to vector<32x128xf32>
    %54 = arith.subf %14, %53 : vector<32x128xf32>
    %55 = arith.mulf %54, %54 : vector<32x128xf32>
    %56 = vector.broadcast %51 : f32 to vector<32x128xf32>
    %57 = arith.mulf %55, %56 : vector<32x128xf32>
    %58 = math.exp %57 : vector<32x128xf32>
    %59 = vector.broadcast %52 : f32 to vector<32x128xf32>
    %60 = arith.mulf %58, %59 : vector<32x128xf32>
    %61 = arith.addf %49, %60 : vector<32x128xf32>
    %c4 = arith.constant 4 : index
    %62 = memref.load %arg1[%c4] : memref<5xf32, #tpu.memory_space<smem>>
    %c4_21 = arith.constant 4 : index
    %63 = memref.load %arg2[%c4_21] : memref<5xf32, #tpu.memory_space<smem>>
    %c4_22 = arith.constant 4 : index
    %64 = memref.load %arg3[%c4_22] : memref<5xf32, #tpu.memory_space<smem>>
    %65 = vector.broadcast %62 : f32 to vector<32x128xf32>
    %66 = arith.subf %14, %65 : vector<32x128xf32>
    %67 = arith.mulf %66, %66 : vector<32x128xf32>
    %68 = vector.broadcast %63 : f32 to vector<32x128xf32>
    %69 = arith.mulf %67, %68 : vector<32x128xf32>
    %70 = math.exp %69 : vector<32x128xf32>
    %71 = vector.broadcast %64 : f32 to vector<32x128xf32>
    %72 = arith.mulf %70, %71 : vector<32x128xf32>
    %73 = arith.addf %61, %72 : vector<32x128xf32>
    %c0_23 = arith.constant 0 : index
    %c0_24 = arith.constant 0 : index
    %74 = vector.load %arg9[%c0_23, %c0_24] : memref<16x32xf32, #tpu.memory_space<vmem>>, vector<16x32xf32>
    %cst_25 = arith.constant dense<0.000000e+00> : vector<16x128xf32>
    %75 = tpu.matmul %74, %73, %cst_25 {dimension_numbers = #tpu.dot_dimension_numbers<[1], [0], [0], [1], [0, 0, 1, 1], [], []>} : vector<16x32xf32>, vector<32x128xf32>, vector<16x128xf32> -> vector<16x128xf32>
    %c0_26 = arith.constant 0 : index
    %c0_27 = arith.constant 0 : index
    %76 = vector.load %arg10[%c0_26, %c0_27] : memref<16x1xf32, #tpu.memory_space<vmem>>, vector<16x1xf32>
    %77 = vector.broadcast %76 : vector<16x1xf32> to vector<16x128xf32>
    %78 = arith.addf %75, %77 : vector<16x128xf32>
    %cst_28 = arith.constant 0.000000e+00 : f32
    %79 = vector.broadcast %cst_28 : f32 to vector<16x128xf32>
    %80 = arith.maximumf %78, %79 : vector<16x128xf32>
    %c0_29 = arith.constant 0 : index
    %c0_30 = arith.constant 0 : index
    %81 = vector.load %arg11[%c0_29, %c0_30] : memref<2x16xf32, #tpu.memory_space<vmem>>, vector<2x16xf32>
    %cst_31 = arith.constant dense<0.000000e+00> : vector<2x128xf32>
    %82 = tpu.matmul %81, %80, %cst_31 {dimension_numbers = #tpu.dot_dimension_numbers<[1], [0], [0], [1], [0, 0, 1, 1], [], []>} : vector<2x16xf32>, vector<16x128xf32>, vector<2x128xf32> -> vector<2x128xf32>
    %c0_32 = arith.constant 0 : index
    %c0_33 = arith.constant 0 : index
    %83 = vector.load %arg12[%c0_32, %c0_33] : memref<2x1xf32, #tpu.memory_space<vmem>>, vector<2x1xf32>
    %84 = vector.broadcast %83 : vector<2x1xf32> to vector<2x128xf32>
    %85 = arith.addf %82, %84 : vector<2x128xf32>
    %c0_34 = arith.constant 0 : index
    %c0_35 = arith.constant 0 : index
    %86 = vector.load %arg13[%c0_34, %c0_35] : memref<2x128xf32, #tpu.memory_space<vmem>>, vector<2x128xf32>
    tpu.vector_store %arg13[%c0_34, %c0_35], %85 {strides = array<i32>} : memref<2x128xf32, #tpu.memory_space<vmem>>, vector<2x128xf32>,
    return
  }
  func.func @transform_0(%arg0: i32) -> i32 {
    %c0_i32 = arith.constant 0 : i32
    %c0_i32_0 = arith.constant 0 : i32
    return %c0_i32 : i32
  }
  func.func @transform_1(%arg0: i32) -> i32 {
    %c0_i32 = arith.constant 0 : i32
    %c0_i32_0 = arith.constant 0 : i32
    return %c0_i32 : i32
  }
  func.func @transform_2(%arg0: i32) -> i32 {
    %c0_i32 = arith.constant 0 : i32
    %c0_i32_0 = arith.constant 0 : i32
    return %c0_i32 : i32
  }
  func.func @transform_3(%arg0: i32) -> (i32, i32) {
    %c0_i32 = arith.constant 0 : i32
    %c0_i32_0 = arith.constant 0 : i32
    return %c0_i32, %arg0 : i32, i32
  }
  func.func @transform_4(%arg0: i32) -> (i32, i32) {
    %c0_i32 = arith.constant 0 : i32
    %c0_i32_0 = arith.constant 0 : i32
    %c0_i32_1 = arith.constant 0 : i32
    return %c0_i32, %c0_i32_0 : i32, i32
  }
  func.func @transform_5(%arg0: i32) -> (i32, i32) {
    %c0_i32 = arith.constant 0 : i32
    %c0_i32_0 = arith.constant 0 : i32
    %c0_i32_1 = arith.constant 0 : i32
    return %c0_i32, %c0_i32_0 : i32, i32
  }
  func.func @transform_6(%arg0: i32) -> (i32, i32) {
    %c0_i32 = arith.constant 0 : i32
    %c0_i32_0 = arith.constant 0 : i32
    %c0_i32_1 = arith.constant 0 : i32
    return %c0_i32, %c0_i32_0 : i32, i32
  }
  func.func @transform_7(%arg0: i32) -> (i32, i32) {
    %c0_i32 = arith.constant 0 : i32
    %c0_i32_0 = arith.constant 0 : i32
    %c0_i32_1 = arith.constant 0 : i32
    return %c0_i32, %c0_i32_0 : i32, i32
  }
  func.func @transform_8(%arg0: i32) -> (i32, i32) {
    %c0_i32 = arith.constant 0 : i32
    %c0_i32_0 = arith.constant 0 : i32
    %c0_i32_1 = arith.constant 0 : i32
    return %c0_i32, %c0_i32_0 : i32, i32
  }
  func.func @transform_9(%arg0: i32) -> (i32, i32) {
    %c0_i32 = arith.constant 0 : i32
    %c0_i32_0 = arith.constant 0 : i32
    %c0_i32_1 = arith.constant 0 : i32
    return %c0_i32, %c0_i32_0 : i32, i32
  }
  func.func @transform_10(%arg0: i32) -> (i32, i32) {
    %c0_i32 = arith.constant 0 : i32
    %c0_i32_0 = arith.constant 0 : i32
    %c0_i32_1 = arith.constant 0 : i32
    return %c0_i32, %c0_i32_0 : i32, i32
  }
  func.func @transform_11(%arg0: i32) -> (i32, i32) {
    %c0_i32 = arith.constant 0 : i32
    %c0_i32_0 = arith.constant 0 : i32
    %c0_i32_1 = arith.constant 0 : i32
    return %c0_i32, %c0_i32_0 : i32, i32
  }
  func.func @transform_12(%arg0: i32) -> (i32, i32) {
    %c0_i32 = arith.constant 0 : i32
    %c0_i32_0 = arith.constant 0 : i32
    return %c0_i32, %arg0 : i32, i32
  }
}

</mosaic_0001>

<bundles_post_ra>
// kernel: tpu_custom_call.1
= control target key start
LH: loop header
LB: loop body
LE: loop exit
PB: predicated region body
PF: predicated region fallthrough
CT: control target
= control target key end

     0   :  { %17 = vsyncpa [#allocation4], 0  ;;  %s1320_s0 = inlined_call_operand.vmem [shape: f32[5], index: 0, kind: input, shape index: {}]   ;;  %s1321_s1 = inlined_call_operand.vmem [shape: f32[5], index: 1, kind: input, shape index: {}]   ;;  %s1322_s2 = inlined_call_operand.vmem [shape: f32[5], index: 2, kind: input, shape index: {}]   ;;  %s1323_s3 = inlined_call_operand.vmem [shape: f32[8,128], index: 3, kind: input, shape index: {}]   ;;  %s1324_s4 = inlined_call_operand.vmem [shape: f32[64,8], index: 4, kind: input, shape index: {}]   ;;  %s1325_s5 = inlined_call_operand.vmem [shape: f32[64,1], index: 5, kind: input, shape index: {}]   ;;  %s1326_s6 = inlined_call_operand.vmem [shape: f32[32,64], index: 6, kind: input, shape index: {}]   ;;  %s1327_s7 = inlined_call_operand.vmem [shape: f32[32,1], index: 7, kind: input, shape index: {}]   ;;  %s1328_s8 = inlined_call_operand.vmem [shape: f32[16,32], index: 8, kind: input, shape index: {}]   ;;  %s1329_s9 = inlined_call_operand.vmem [shape: f32[16,1], index: 9, kind: input, shape index: {}]   ;;  %s1330_s10 = inlined_call_operand.vmem [shape: f32[2,16], index: 10, kind: input, shape index: {}]   ;;  %s1331_s11 = inlined_call_operand.vmem [shape: f32[2,1], index: 11, kind: input, shape index: {}]   ;;  %s1332_s12 = inlined_call_operand.hbm [shape: f32[2,128], index: 12, kind: output, shape index: {}]  }
   0x1   :  { %18 = vsyncpa [#allocation6], 0  ;;  %s36_s23 = sshll.u32 %s1321_s1, 4  ;;  %s37_s23 = int_to_ptr.vmem [resolvable:$true] %s36_s23 }
   0x2   :  { %19 = vsyncpa [#allocation3], 0  ;;  %s26_s26 = sshll.u32 %s1320_s0, 4  ;;  %s953_s27 = scalar_lea.vmem %s37_s23, 16  ;;  %s27_s26 = int_to_ptr.vmem [resolvable:$true] %s26_s26 }
   0x3   :  { %p954_p0 = scmp.ne.s32.totalorder %s37_s23, %s953_s27  ;;  %p958_p1 = scmp.lt.s32.totalorder %s37_s23, %s37_s23 }
   0x4   :  { %p959_p2 = scmp.lt.s32.totalorder %s953_s27, %s953_s27 }
   0x6   :  { %p960_p3 = por %p959_p2, %p958_p1 }
   0x8   :  { %p961_p4 = pnand %p960_p3, %p954_p0 }
   0xa   :  { %964 = shalt.err (!%p961_p4)
}
   0xb   :  { %s1017_s28 = smov [#allocation5]   ;;  %s965_s29 = scalar_lea.vmem %s27_s26, 16 }
   0xc   :  { %39 = dma.vmem_to_smem %s37_s23, 16, %s1017_s28, [#allocation6]  }
   0xd   :  { %p966_p5 = scmp.ne.s32.totalorder %s27_s26, %s965_s29  ;;  %p970_p6 = scmp.lt.s32.totalorder %s27_s26, %s27_s26 }
   0xe   :  { %p971_p7 = scmp.lt.s32.totalorder %s965_s29, %s965_s29 }
  0x10   :  { %p972_p8 = por %p971_p7, %p970_p6 }
  0x12   :  { %p973_p9 = pnand %p972_p8, %p966_p5 }
  0x14   :  { %976 = shalt.err (!%p973_p9)
}
  0x15   :  { %s1018_s1 = smov [#allocation2]   ;;  %s46_s13 = sshll.u32 %s1322_s2, 4  ;;  %s47_s13 = int_to_ptr.vmem [resolvable:$true] %s46_s13 }
  0x16   :  { %29 = dma.vmem_to_smem %s27_s26, 16, %s1018_s1, [#allocation4]  }
  0x17   :  { %s977_s14 = scalar_lea.vmem %s47_s13, 16  ;;  %p982_p11 = scmp.lt.s32.totalorder %s47_s13, %s47_s13 }
  0x18   :  { %p978_p10 = scmp.ne.s32.totalorder %s47_s13, %s977_s14  ;;  %p983_p12 = scmp.lt.s32.totalorder %s977_s14, %s977_s14 }
  0x1a   :  { %p984_p13 = por %p983_p12, %p982_p11 }
  0x1c   :  { %p985_p0 = pnand %p984_p13, %p978_p10 }
  0x1e   :  { %988 = shalt.err (!%p985_p0)
}
  0x1f   :  { %s1019_s15 = smov [#allocation7]  }
  0x20   :  { %49 = dma.vmem_to_smem %s47_s13, 16, %s1019_s15, [#allocation6]  }
  0x21   :  { %1011 = dma.done.wait [#allocation4], 16  }
  0x22   :  { %1012 = vsyncadd [#allocation4], 4294967280 }
  0x23   :  { %1013 = dma.done.wait [#allocation6], 32  }
  0x24   :  { %1014 = vsyncadd [#allocation6], 4294967264 }
  0x25   :  { %77 = sfence }
  0x26   :  { %v78_v0 = vld [vmem:[%s1323_s3] sm:$0xff]  ;;  %vm135_vm0 = vcmask 64512   ;;  %v80_v2 = vld [vmem:[%s1324_s4 + $0x8] sm:$0xff]  ;;  %v81_v3 = vld [vmem:[%s1324_s4 + $0x10] sm:$0xff]  ;;  %v1020_v4 = vmov 0   ;;  %vm301_vm1 = vcmask 523264  }
  0x27   :  { %v79_v1 = vld [vmem:[%s1324_s4] sm:$0xff]  ;;  %822 = vmatprep.subr.mxu0 %v78_v0  ;;  %911 = vset.pattern.permute.xlu0 %v1020_v4  ;;  %v89_v6 = vld [vmem:[%s1325_s5 + $0x10] sm:$0xff]  ;;  %v82_v7 = vld [vmem:[%s1324_s4 + $0x18] sm:$0xff]  ;;  %vm583_vm2 = vcmask 261120   ;;  %s403_s23 = sld [smem:[#allocation2]]  ;;  %s777_s24 = sld [smem:[#allocation2 + $0x1]] }
  0x28   :  { %824 = vmatprep.mubr.msk.f32.mxu0 %vm135_vm0, %v79_v1  ;;  %823 = vmatpush3.msra.mxu0 %v78_v0  ;;  %v87_v5 = vld [vmem:[%s1325_s5] sm:$0xff]  ;;  %v88_v9 = vld [vmem:[%s1325_s5 + $0x8] sm:$0xff]  ;;  %v90_v10 = vld [vmem:[%s1325_s5 + $0x18] sm:$0xff]  ;;  %s780_s25 = sld [smem:[#allocation2 + $0x2]]  ;;  %s783_s26 = sld [smem:[#allocation2 + $0x3]]  ;;  %vm1022_vm3 = vmmov 0  }
  0x29   :  { %825 = vmatmul.mubr.msk.f32.vlgmr.msra.gmra.mrb[0].mxu0 %vm135_vm0, %v80_v2  ;;  %912 = vset.pattern.permute.xlu1 %v1020_v4  ;;  %v83_v8 = vld [vmem:[%s1324_s4 + $0x20] sm:$0xff]  ;;  %v84_v11 = vld [vmem:[%s1324_s4 + $0x28] sm:$0xff]  ;;  %v85_v12 = vld [vmem:[%s1324_s4 + $0x30] sm:$0xff]  ;;  %s786_s27 = sld [smem:[#allocation2 + $0x4]]  ;;  %s404_s28 = sld [smem:[#allocation5]]  ;;  %vm674_vm4 = vcmask 130048  }
  0x2a   :  { %827 = vmatprep.mubr.msk.f32.mxu0 %vm135_vm0, %v81_v3  ;;  %97 = vperm.xlu0 %911, %v87_v5   ;;  %v91_v13 = vld [vmem:[%s1325_s5 + $0x20] sm:$0xff]  ;;  %v92_v14 = vld [vmem:[%s1325_s5 + $0x28] sm:$0xff]  ;;  %v86_v15 = vld [vmem:[%s1324_s4 + $0x38] sm:$0xff]  ;;  %s778_s4 = sld [smem:[#allocation5 + $0x1]]  ;;  %s781_s29 = sld [smem:[#allocation5 + $0x2]] }
  0x2b   :  { %107 = vperm.xlu1 %912, %v89_v6   ;;  %v93_v16 = vld [vmem:[%s1325_s5 + $0x30] sm:$0xff]  ;;  %v94_v17 = vld [vmem:[%s1325_s5 + $0x38] sm:$0xff]  ;;  %v277_v18 = vld [vmem:[%s1327_s7] sm:$0xff]  ;;  %s784_s1 = sld [smem:[#allocation5 + $0x3]]  ;;  %s787_s0 = sld [smem:[#allocation5 + $0x4]] }
  0x2c   :  { %v278_v19 = vld [vmem:[%s1327_s7 + $0x8] sm:$0xff]  ;;  %v279_v20 = vld [vmem:[%s1327_s7 + $0x10] sm:$0xff]  ;;  %v280_v21 = vld [vmem:[%s1327_s7 + $0x18] sm:$0xff]  ;;  %s1221_s5 = sld [smem:[#allocation7 + $0x1]]  ;;  %s1223_s30 = sld [smem:[#allocation7 + $0x2]] }
  0x2d   :  { %828 = vmatmul.mubr.msk.f32.gmra.mrb[2].mxu0 %vm135_vm0, %v82_v7  ;;  %v571_v22 = vld [vmem:[%s1329_s9] sm:$0xff]  ;;  %v572_v23 = vld [vmem:[%s1329_s9 + $0x8] sm:$0xff]  ;;  %v275_v63 = vld [vmem:[%s1326_s6 + $0x10] sm:$0xff]  ;;  %v1199_v6 = vstv %s403_s23  ;;  %s1237_s13 = sld [smem:[#allocation7 + $0x3]]  ;;  %s1239_s14 = sld [smem:[#allocation7 + $0x4]] }
  0x2e   :  { %830 = vmatprep.mubr.msk.f32.mxu0 %vm135_vm0, %v83_v8  ;;  %102 = vperm.xlu0 %911, %v88_v9   ;;  %v668_v24 = vld [vmem:[%s1331_s11] sm:$0x3]  ;;  %v274_v62 = vld [vmem:[%s1326_s6 + $0x8] sm:$0xff]  ;;  %v276_v0 = vld [vmem:[%s1326_s6 + $0x18] sm:$0xff]  ;;  %v1201_v7 = vstv %s777_s24 }
  0x2f   :  { %112 = vperm.xlu1 %912, %v90_v10   ;;  %v273_v25 = vld [vmem:[%s1326_s6] sm:$0xff]  ;;  %s405_s6 = sld [smem:[#allocation7]]  ;;  %v1203_v9 = vstv %s780_s25  ;;  %v1205_v10 = vstv %s783_s26 }
  0x30   :  { %852 = vmatprep.mubr.msk.f32.mxu1 %vm301_vm1, %v273_v25  ;;  %v569_v1 = vld [vmem:[%s1328_s8] sm:$0xff] }
  0x31   :  { %831 = vmatmul.mubr.msk.f32.gmra.mrb[4].mxu0 %vm135_vm0, %v84_v11  ;;  %v1207_v11 = vstv %s786_s27 }
  0x32   :  { %833 = vmatprep.mubr.msk.f32.mxu0 %vm135_vm0, %v85_v12  ;;  %117 = vperm.xlu0 %911, %v91_v13  }
  0x33   :  { %122 = vperm.xlu1 %912, %v92_v14   ;;  %v1209_v14 = vstv %s404_s28 }
  0x35   :  { %834 = vmatmul.mubr.msk.f32.gmra.mrb[6].mxu0 %vm135_vm0, %v86_v15  ;;  %v1211_v15 = vstv %s778_s4 }
  0x36   :  { %127 = vperm.xlu0 %911, %v93_v16   ;;  %866 = vmatprep.mubr.msk.f32.mxu0 %vm583_vm2, %v569_v1  ;;  %v1213_v16 = vstv %s781_s29 }
  0x37   :  { %132 = vperm.xlu1 %912, %v94_v17   ;;  %v1215_v17 = vstv %s784_s1 }
  0x3a   :  { %283 = vperm.xlu0 %911, %v277_v18   ;;  %v1217_v18 = vstv %s787_s0 }
  0x3b   :  { %288 = vperm.xlu1 %912, %v278_v19  }
  0x3e   :  { %293 = vperm.xlu0 %911, %v279_v20  }
  0x3f   :  { %298 = vperm.xlu1 %912, %v280_v21   ;;  %v1219_v21 = vstv %s405_s6 }
  0x42   :  { %575 = vperm.xlu0 %911, %v571_v22  }
  0x43   :  { %580 = vperm.xlu1 %912, %v572_v23  }
  0x46   :  { %671 = vperm.xlu0 %911, %v668_v24  }
  0xa9   :  { %v98_v26 = vpop.permute.xlu0 %97 }
  0xaa   :  { %v108_v27 = vpop.permute.xlu1 %107 }
  0xad   :  { %v103_v28 = vpop.permute.xlu0 %102 }
  0xae   :  { %v113_v29 = vpop.permute.xlu1 %112 }
  0xb1   :  { %v118_v42 = vpop.permute.xlu0 %117 }
  0xb2   :  { %v123_v39 = vpop.permute.xlu1 %122 }
  0xb5   :  { %v128_v54 = vpop.permute.xlu0 %127 }
  0xb6   :  { %v133_v51 = vpop.permute.xlu1 %132 }
  0xb9   :  { %v284_v4 = vpop.permute.xlu0 %283 }
  0xba   :  { %v289_v2 = vpop.permute.xlu1 %288 }
  0xfc   :  { %v826_v30 = vpop.f32.mrb[0].mxu0 }
  0xfd   :  { %v232_v31 = vadd.f32 %v826_v30, %v103_v28  ;;  %v226_v32 = vpop.f32.mrb[1].mxu0 }
  0xfe   :  { %v227_v33 = vadd.f32 %v226_v32, %v98_v26 }
  0xff   :  { %v266_v34 = vmax.f32 %v232_v31, 0.0 }
 0x100   :  { %v265_v35 = vmax.f32 %v227_v33, 0.0  ;;  %v829_v36 = vpop.f32.mrb[2].mxu0 }
 0x101   :  { %v242_v37 = vadd.f32 %v829_v36, %v113_v29  ;;  %v236_v38 = vpop.f32.mrb[3].mxu0 }
 0x102   :  { %v237_v40 = vadd.f32 %v236_v38, %v108_v27  ;;  %v876_v41 = vpack.c.bf16 %v266_v34, %v265_v35 }
 0x103   :  { %v268_v43 = vmax.f32 %v242_v37, 0.0 }
 0x104   :  { %v267_v44 = vmax.f32 %v237_v40, 0.0  ;;  %v832_v45 = vpop.f32.mrb[4].mxu0  ;;  %877 = vmatprep.subr.bf16.mxu1 %v876_v41 }
 0x105   :  { %v252_v46 = vadd.f32 %v832_v45, %v123_v39  ;;  %v246_v47 = vpop.f32.mrb[5].mxu0  ;;  %879 = vmatpush3.bf16.msra.mxu1 %v876_v41 }
 0x106   :  { %v880_v48 = vpack.c.bf16 %v268_v43, %v267_v44  ;;  %v247_v49 = vadd.f32 %v246_v47, %v118_v42 }
 0x107   :  { %v270_v50 = vmax.f32 %v252_v46, 0.0 }
 0x108   :  { %v269_v52 = vmax.f32 %v247_v49, 0.0  ;;  %v835_v53 = vpop.f32.mrb[6].mxu0  ;;  %881 = vmatprep.subr.bf16.mxu1 %v880_v48 }
 0x109   :  { %v262_v55 = vadd.f32 %v835_v53, %v133_v51  ;;  %v256_v56 = vpop.f32.mrb[7].mxu0  ;;  %883 = vmatpush3.bf16.msra.mxu1 %v880_v48  ;;  %v1248_v53 = vstv %s1221_s5 }
 0x10a   :  { %v884_v57 = vpack.c.bf16 %v270_v50, %v269_v52  ;;  %v257_v58 = vadd.f32 %v256_v56, %v128_v54  ;;  %v1251_v54 = vstv %s1223_s30  ;;  %v299_v56 = vpop.permute.xlu1 %298 }
 0x10b   :  { %v272_v59 = vmax.f32 %v262_v55, 0.0  ;;  %v294_v55 = vpop.permute.xlu0 %293 }
 0x10c   :  { %v271_v60 = vmax.f32 %v257_v58, 0.0  ;;  %885 = vmatprep.subr.bf16.mxu1 %v884_v57 }
 0x10d   :  { %887 = vmatpush3.bf16.msra.mxu1 %v884_v57 }
 0x10e   :  { %v888_v61 = vpack.c.bf16 %v272_v59, %v271_v60 }
 0x110   :  { %889 = vmatprep.subr.bf16.mxu1 %v888_v61 }
 0x111   :  { %891 = vmatpush3.bf16.msra.mxu1 %v888_v61 }
 0x114   :  { %853 = vmatmul.mubr.msk.f32.vlgmr.msra.gmra.mrb[0].mxu1 %vm301_vm1, %v274_v62 }
 0x115   :  { %855 = vmatprep.mubr.msk.f32.mxu1 %vm301_vm1, %v275_v63 }
 0x118   :  { %856 = vmatmul.mubr.msk.f32.gmra.mrb[2].mxu1 %vm301_vm1, %v276_v0 }
 0x1e7   :  { %v854_v3 = vpop.f32.mrb[0].mxu1 }
 0x1e8   :  { %v386_v5 = vadd.f32 %v854_v3, %v289_v2  ;;  %v380_v8 = vpop.f32.mrb[1].mxu1 }
 0x1e9   :  { %v381_v12 = vadd.f32 %v380_v8, %v284_v4  ;;  %v1256_v8 = vstv %s1237_s13 }
 0x1ea   :  { %v400_v13 = vmax.f32 %v386_v5, 0.0 }
 0x1eb   :  { %v399_v19 = vmax.f32 %v381_v12, 0.0  ;;  %v857_v20 = vpop.f32.mrb[2].mxu1  ;;  %v1259_v12 = vstv %s1239_s14 }
 0x1ec   :  { %v408_v22 = vsub.f32 %v400_v13, %v1199_v6  ;;  %v438_v23 = vsub.f32 %v400_v13, %v1201_v7  ;;  %v472_v24 = vsub.f32 %v400_v13, %v1203_v9  ;;  %v506_v25 = vsub.f32 %v400_v13, %v1205_v10  ;;  %v390_v26 = vpop.f32.mrb[3].mxu1 }
 0x1ed   :  { %v540_v27 = vsub.f32 %v400_v13, %v1207_v11  ;;  %v407_v28 = vsub.f32 %v399_v19, %v1199_v6  ;;  %v437_v29 = vsub.f32 %v399_v19, %v1201_v7  ;;  %v471_v30 = vsub.f32 %v399_v19, %v1203_v9 }
 0x1ee   :  { %v412_v31 = vmul.f32 %v408_v22, %v408_v22  ;;  %v442_v32 = vmul.f32 %v438_v23, %v438_v23  ;;  %v476_v33 = vmul.f32 %v472_v24, %v472_v24  ;;  %v510_v34 = vmul.f32 %v506_v25, %v506_v25 }
 0x1ef   :  { %v544_v35 = vmul.f32 %v540_v27, %v540_v27  ;;  %v411_v36 = vmul.f32 %v407_v28, %v407_v28  ;;  %v441_v37 = vmul.f32 %v437_v29, %v437_v29  ;;  %v475_v38 = vmul.f32 %v471_v30, %v471_v30 }
 0x1f0   :  { %v417_v39 = vmul.f32 %v1209_v14, %v412_v31  ;;  %v447_v40 = vmul.f32 %v1211_v15, %v442_v32  ;;  %v481_v41 = vmul.f32 %v1213_v16, %v476_v33  ;;  %v515_v42 = vmul.f32 %v1215_v17, %v510_v34 }
 0x1f1   :  { %v549_v43 = vmul.f32 %v1217_v18, %v544_v35  ;;  %v416_v44 = vmul.f32 %v1209_v14, %v411_v36  ;;  %v446_v45 = vmul.f32 %v1211_v15, %v441_v37  ;;  %v480_v46 = vmul.f32 %v1213_v16, %v475_v38 }
 0x1f2   :  { %v422_v47 = vmul.f32 1.442695, %v417_v39  ;;  %v452_v48 = vmul.f32 1.442695, %v447_v40  ;;  %v486_v49 = vmul.f32 1.442695, %v481_v41  ;;  %v505_v50 = vsub.f32 %v399_v19, %v1205_v10 }
 0x1f3   :  { %v520_v51 = vmul.f32 1.442695, %v515_v42  ;;  %v539_v52 = vsub.f32 %v399_v19, %v1207_v11  ;;  %v554_v57 = vmul.f32 1.442695, %v549_v43  ;;  %v420_v58 = vmul.f32 1.442695, %v416_v44 }
 0x1f4   :  { %913 = vpow2.f32 %v422_v47  ;;  %v509_v59 = vmul.f32 %v505_v50, %v505_v50  ;;  %v396_v61 = vadd.f32 %v857_v20, %v299_v56  ;;  %v391_v62 = vadd.f32 %v390_v26, %v294_v55 }
 0x1f5   :  { %915 = vpow2.f32 %v452_v48  ;;  %v543_v60 = vmul.f32 %v539_v52, %v539_v52  ;;  %v450_v63 = vmul.f32 1.442695, %v446_v45  ;;  %v484_v0 = vmul.f32 1.442695, %v480_v46 }
 0x1f6   :  { %917 = vpow2.f32 %v486_v49  ;;  %v514_v1 = vmul.f32 %v1215_v17, %v509_v59  ;;  %v402_v3 = vmax.f32 %v396_v61, 0.0  ;;  %v401_v4 = vmax.f32 %v391_v62, 0.0 }
 0x1f7   :  { %919 = vpow2.f32 %v520_v51  ;;  %v548_v2 = vmul.f32 %v1217_v18, %v543_v60 }
 0x1f8   :  { %921 = vpow2.f32 %v554_v57  ;;  %v518_v5 = vmul.f32 1.442695, %v514_v1  ;;  %v410_v19 = vsub.f32 %v402_v3, %v1199_v6  ;;  %v440_v20 = vsub.f32 %v402_v3, %v1201_v7 }
 0x1f9   :  { %923 = vpow2.f32 %v420_v58  ;;  %v552_v13 = vmul.f32 1.442695, %v548_v2  ;;  %v474_v22 = vsub.f32 %v402_v3, %v1203_v9  ;;  %v508_v23 = vsub.f32 %v402_v3, %v1205_v10 }
 0x1fa   :  { %925 = vpow2.f32 %v450_v63  ;;  %v542_v24 = vsub.f32 %v402_v3, %v1207_v11  ;;  %v414_v25 = vmul.f32 %v410_v19, %v410_v19  ;;  %v444_v26 = vmul.f32 %v440_v20, %v440_v20 }
 0x1fb   :  { %927 = vpow2.f32 %v484_v0  ;;  %v409_v27 = vsub.f32 %v401_v4, %v1199_v6  ;;  %v478_v28 = vmul.f32 %v474_v22, %v474_v22  ;;  %v512_v29 = vmul.f32 %v508_v23, %v508_v23 }
 0x1fc   :  { %929 = vpow2.f32 %v518_v5  ;;  %v546_v30 = vmul.f32 %v542_v24, %v542_v24  ;;  %v419_v31 = vmul.f32 %v1209_v14, %v414_v25  ;;  %v449_v32 = vmul.f32 %v1211_v15, %v444_v26 }
 0x1fd   :  { %931 = vpow2.f32 %v552_v13  ;;  %v413_v33 = vmul.f32 %v409_v27, %v409_v27  ;;  %v483_v35 = vmul.f32 %v1213_v16, %v478_v28  ;;  %v517_v36 = vmul.f32 %v1215_v17, %v512_v29 }
 0x1fe   :  { %v914_v34 = vpop.eup %913  ;;  %v551_v37 = vmul.f32 %v1217_v18, %v546_v30  ;;  %v439_v38 = vsub.f32 %v401_v4, %v1201_v7  ;;  %v426_v39 = vmul.f32 1.442695, %v419_v31  ;;  %v456_v40 = vmul.f32 1.442695, %v449_v32 }
 0x1ff   :  { %v916_v6 = vpop.eup %915  ;;  %v418_v41 = vmul.f32 %v1209_v14, %v413_v33  ;;  %v473_v42 = vsub.f32 %v401_v4, %v1203_v9  ;;  %v490_v44 = vmul.f32 1.442695, %v483_v35  ;;  %v524_v45 = vmul.f32 1.442695, %v517_v36 }
 0x200   :  { %v918_v43 = vpop.eup %917  ;;  %v558_v46 = vmul.f32 1.442695, %v551_v37  ;;  %v443_v47 = vmul.f32 %v439_v38, %v439_v38  ;;  %933 = vpow2.f32 %v426_v39  ;;  %v507_v51 = vsub.f32 %v401_v4, %v1205_v10 }
 0x201   :  { %v920_v48 = vpop.eup %919  ;;  %v424_v49 = vmul.f32 1.442695, %v418_v41  ;;  %v477_v50 = vmul.f32 %v473_v42, %v473_v42  ;;  %935 = vpow2.f32 %v456_v40  ;;  %v541_v55 = vsub.f32 %v401_v4, %v1207_v11 }
 0x202   :  { %v922_v52 = vpop.eup %921  ;;  %v448_v7 = vmul.f32 %v1211_v15, %v443_v47  ;;  %v430_v14 = vmul.f32 %v914_v34, %v1219_v21  ;;  %937 = vpow2.f32 %v490_v44  ;;  %v511_v57 = vmul.f32 %v507_v51, %v507_v51 }
 0x203   :  { %v924_v9 = vpop.eup %923  ;;  %v482_v56 = vmul.f32 %v1213_v16, %v477_v50  ;;  %v460_v58 = vmul.f32 %v916_v6, %v1248_v53  ;;  %939 = vpow2.f32 %v524_v45  ;;  %v545_v61 = vmul.f32 %v541_v55, %v541_v55 }
 0x204   :  { %v926_v59 = vpop.eup %925  ;;  %v454_v60 = vmul.f32 1.442695, %v448_v7  ;;  %v429_v10 = vmul.f32 %v924_v9, %v1219_v21  ;;  %941 = vpow2.f32 %v558_v46  ;;  %v516_v11 = vmul.f32 %v1215_v17, %v511_v57 }
 0x205   :  { %v928_v62 = vpop.eup %927  ;;  %v488_v15 = vmul.f32 1.442695, %v482_v56  ;;  %v459_v63 = vmul.f32 %v926_v59, %v1248_v53  ;;  %943 = vpow2.f32 %v424_v49  ;;  %v550_v16 = vmul.f32 %v1217_v18, %v545_v61  ;;  %v581_v56 = vpop.permute.xlu1 %580 }
 0x206   :  { %v930_v0 = vpop.eup %929  ;;  %v464_v1 = vadd.f32 %v460_v58, %v430_v14  ;;  %v493_v2 = vmul.f32 %v928_v62, %v1251_v54  ;;  %945 = vpow2.f32 %v454_v60  ;;  %v522_v4 = vmul.f32 1.442695, %v516_v11  ;;  %v576_v58 = vpop.permute.xlu0 %575 }
 0x207   :  { %v932_v3 = vpop.eup %931  ;;  %v463_v5 = vadd.f32 %v459_v63, %v429_v10  ;;  %v494_v13 = vmul.f32 %v918_v43, %v1251_v54  ;;  %947 = vpow2.f32 %v488_v15  ;;  %v556_v19 = vmul.f32 1.442695, %v550_v16  ;;  %v667_v15 = vld [vmem:[%s1330_s10] sm:$0x3] }
 0x208   :  { %v527_v20 = vmul.f32 %v930_v0, %v1256_v8  ;;  %949 = vpow2.f32 %v522_v4  ;;  %v528_v23 = vmul.f32 %v920_v48, %v1256_v8  ;;  %v561_v18 = vmul.f32 %v932_v3, %v1259_v12 }
 0x209   :  { %v497_v17 = vadd.f32 %v493_v2, %v463_v5  ;;  %v498_v22 = vadd.f32 %v494_v13, %v464_v1  ;;  %951 = vpow2.f32 %v556_v19  ;;  %v562_v27 = vmul.f32 %v922_v52, %v1259_v12 }
 0x20a   :  { %v934_v24 = vpop.eup %933  ;;  %v672_v11 = vpop.permute.xlu0 %671 }
 0x20b   :  { %v531_v25 = vadd.f32 %v527_v20, %v497_v17  ;;  %v532_v26 = vadd.f32 %v528_v23, %v498_v22  ;;  %v936_v28 = vpop.eup %935  ;;  %v432_v29 = vmul.f32 %v934_v24, %v1219_v21 }
 0x20c   :  { %v938_v30 = vpop.eup %937  ;;  %v462_v33 = vmul.f32 %v936_v28, %v1248_v53 }
 0x20d   :  { %v565_v31 = vadd.f32 %v561_v18, %v531_v25  ;;  %v566_v32 = vadd.f32 %v562_v27, %v532_v26  ;;  %v940_v34 = vpop.eup %939  ;;  %v496_v38 = vmul.f32 %v938_v30, %v1251_v54 }
 0x20e   :  { %v942_v35 = vpop.eup %941  ;;  %v466_v37 = vadd.f32 %v462_v33, %v432_v29  ;;  %v530_v44 = vmul.f32 %v940_v34, %v1256_v8 }
 0x20f   :  { %v892_v36 = vpack.c.bf16 %v566_v32, %v565_v31  ;;  %v944_v6 = vpop.eup %943  ;;  %v564_v52 = vmul.f32 %v942_v35, %v1259_v12 }
 0x210   :  { %v946_v39 = vpop.eup %945  ;;  %v431_v40 = vmul.f32 %v944_v6, %v1219_v21  ;;  %v500_v41 = vadd.f32 %v496_v38, %v466_v37 }
 0x211   :  { %893 = vmatprep.subr.bf16.mxu0 %v892_v36  ;;  %v948_v42 = vpop.eup %947  ;;  %v461_v43 = vmul.f32 %v946_v39, %v1248_v53  ;;  %v570_v53 = vld [vmem:[%s1328_s8 + $0x8] sm:$0xff]  ;;  %s1024_s8 = smov [#allocation8]  }
 0x212   :  { %895 = vmatpush3.bf16.msra.mxu0 %v892_v36  ;;  %v950_v45 = vpop.eup %949  ;;  %v495_v47 = vmul.f32 %v948_v42, %v1251_v54  ;;  %v534_v48 = vadd.f32 %v530_v44, %v500_v41  ;;  %v1021_v54 = vmov 0.0|0.0   ;;  %s755_s18 = sshll.u32 %s1024_s8, 4  ;;  %s756_s18 = int_to_ptr.vmem [resolvable:$true] %s755_s18 }
 0x213   :  { %v465_v46 = vadd.f32 %v461_v43, %v431_v40  ;;  %v952_v49 = vpop.eup %951  ;;  %v529_v51 = vmul.f32 %v950_v45, %v1256_v8  ;;  %v1023_v8 = vmov 0.0   ;;  %s989_s7 = scalar_lea.vmem %s756_s18, 32  ;;  %p994_p2 = scmp.lt.s32.totalorder %s756_s18, %s756_s18 }
 0x214   :  { %v563_v21 = vmul.f32 %v952_v49, %v1259_v12  ;;  %v568_v55 = vadd.f32 %v564_v52, %v534_v48  ;;  %p990_p1 = scmp.ne.s32.totalorder %s756_s18, %s989_s7  ;;  %p995_p3 = scmp.lt.s32.totalorder %s989_s7, %s989_s7 }
 0x215   :  { %v499_v50 = vadd.f32 %v495_v47, %v465_v46 }
 0x216   :  { %p996_p4 = por %p995_p3, %p994_p2 }
 0x217   :  { %v533_v7 = vadd.f32 %v529_v51, %v499_v50 }
 0x218   :  { %p997_p5 = pnand %p996_p4, %p990_p1 }
 0x219   :  { %v567_v14 = vadd.f32 %v563_v21, %v533_v7 }
 0x21b   :  { %v896_v9 = vpack.c.bf16 %v568_v55, %v567_v14 }
 0x21d   :  { %897 = vmatprep.subr.bf16.mxu0 %v896_v9 }
 0x21e   :  { %899 = vmatpush3.bf16.msra.mxu0 %v896_v9 }
 0x21f   :  { %900 = vmatprep.subr.bf16.mxu0 %v1021_v54 }
 0x221   :  { %867 = vmatmul.mubr.msk.f32.vlgmr.msra.gmra.mrb[8].mxu0 %vm583_vm2, %v570_v53 }
 0x222   :  { %873 = vmatprep.mubr.msk.f32.mxu0 %vm1022_vm3, %v1023_v8 }
 0x2f4   :  { %v868_v57 = vpop.f32.mrb[8].mxu0 }
 0x2f5   :  { %v662_v12 = vadd.f32 %v868_v57, %v581_v56  ;;  %v656_v59 = vpop.f32.mrb[9].mxu0 }
 0x2f6   :  { %v657_v60 = vadd.f32 %v656_v59, %v576_v58 }
 0x2f7   :  { %v666_v61 = vmax.f32 %v662_v12, 0.0 }
 0x2f8   :  { %v665_v10 = vmax.f32 %v657_v60, 0.0 }
 0x2fa   :  { %v901_v62 = vpack.c.bf16 %v666_v61, %v665_v10 }
 0x2fc   :  { %902 = vmatpush3.bf16.msra.mxu0 %v901_v62 }
 0x2ff   :  { %874 = vmatmul.mubr.msk.f32.vlgmr.msra.gmra.mrb[10].mxu0 %vm674_vm4, %v667_v15 }
 0x3d2   :  { %v744_v63 = vpop.f32.mrb[10].mxu0 }
 0x3d3   :  { %v745_v0 = vadd.f32 %v744_v63, %v672_v11  ;;  %v875_v16 = vpop.f32.mrb[11].mxu0 }
 0x3d5   :  { %748 = vst [vmem:[#allocation8] sm:$0x3] %v745_v0 }
 0x3d6   :  { %1000 = shalt.err (!%p997_p5)
}
 0x3d7   :  { %s1001_s10 = scalar_lea.hbm %s1332_s12, 32 }
 0x3d8   :  { %p1002_p6 = scmp.ne.s32.totalorder %s1332_s12, %s1001_s10  ;;  %p1005_p7 = scmp.lt.u32.totalorder %s1001_s10, %s1332_s12 }
 0x3da   :  { %p1007_p8 = pnand %p1005_p7, %p1002_p6 }
 0x3dc   :  { %1010 = shalt.err (!%p1007_p8)
}
 0x3dd   :  { %758 = dma.vmem_to_hbm [thread:$0]  %s756_s18, 32, %s1332_s12, [#allocation3]  }
 0x3de   :  { %1015 = dma.done.wait [#allocation3], 32  }
 0x3df   :  { %1016 = vsyncadd [#allocation3], 4294967264 }
 0x3e0   :  { %762 = vsyncpa [#allocation3], 1 }
 0x3e1   :  { %763 = vsyncpa [#allocation4], 1 }
 0x3e2   :  { %764 = vsyncpa [#allocation6], 1 }

</bundles_post_ra>
